<compile_context>
chip_gen: v7x
topology: tpu7x:2x2x1
jax: 0.10.0
libtpu: 0.0.40
codegen_flags: <defaults>
</compile_context>

<pallas_src>
import functools

import jax
import jax.numpy as jnp
import numpy as np
from jax.experimental import pallas as pl
from jax.experimental.pallas import tpu as pltpu


# ----------------------------- Pallas kernel -----------------------------

def _linear_kernel(x_ref, w_ref, b_ref, o_ref):
    # x_ref: (tm, Dp) bf16, w_ref: (Dp, Cp) bf16, b_ref: (1, Cp) f32
    # Single-step K: one MXU dot (f32 accumulation) + bias, stored directly.
    o_ref[...] = (jnp.dot(x_ref[...], w_ref[...],
                          preferred_element_type=jnp.float32)
                  + b_ref[...]).astype(o_ref.dtype)


# ----------------------------- packing (init-time, off the hot path) ------

def _round_up(n, m):
    return ((n + m - 1) // m) * m


def pack_linear_params(weight, bias, *, compute_dtype=jnp.bfloat16):
    """Pre-pack PyTorch-layout Linear params once (not per forward call).

    weight: (C, D) f32, bias: (C,) f32
    Returns (w_packed (Dp, Cp) compute_dtype, b_packed (1, Cp) f32, C, D).
    """
    C, D = weight.shape
    Dp = _round_up(D, 128)
    Cp = _round_up(C, 128)
    w_packed = jnp.zeros((Dp, Cp), compute_dtype).at[:D, :C].set(
        jnp.asarray(weight).T.astype(compute_dtype))
    b_packed = jnp.zeros((1, Cp), jnp.float32).at[0, :C].set(
        jnp.asarray(bias).astype(jnp.float32))
    return w_packed, b_packed, C, D


def _pick_tile(n, candidates):
    for t in candidates:
        if n % t == 0:
            return t
    return n


# ----------------------------- forward (hot path) -------------------------

@functools.partial(jax.jit, static_argnames=("num_classes", "feat_dim"))
def linear_classifier(features, w_packed, b_packed, *, num_classes, feat_dim):
    """features: (B, D) f32; w_packed/b_packed from pack_linear_params.

    Returns (B, num_classes) f32 = features @ W.T + b.
    """
    B, D = features.shape
    assert D == feat_dim
    Dp, Cp = w_packed.shape
    compute_dtype = w_packed.dtype

    # bf16 packs 2 rows per sublane -> pad batch to a multiple of 16.
    Bp = _round_up(max(B, 16), 16)

    x = features.astype(compute_dtype)
    # D == 2048 is already lane-aligned; only pad if the general case needs it.
    pad_d = Dp - D
    x = jnp.pad(x, ((0, Bp - B), (0, pad_d)))

    tm = _pick_tile(Bp, (256, 128, 64, 32, 16))
    grid = (Bp // tm,)

    out_padded = pl.pallas_call(
        _linear_kernel,
        out_shape=jax.ShapeDtypeStruct((Bp, Cp), jnp.float32),
        grid=grid,
        in_specs=[
            pl.BlockSpec((tm, Dp), lambda i: (i, 0)),   # activations (whole K)
            pl.BlockSpec((Dp, Cp), lambda i: (0, 0)),   # packed weights
            pl.BlockSpec((1, Cp), lambda i: (0, 0)),    # packed bias
        ],
        out_specs=pl.BlockSpec((tm, Cp), lambda i: (i, 0)),
        compiler_params=pltpu.CompilerParams(
            dimension_semantics=("parallel",)),
    )(x, w_packed, b_packed)

    return out_padded[:B, :num_classes]


# ----------------------------- main -----------------------------

if __name__ == "__main__":
    key = jax.random.PRNGKey(0)
    k_x, k_w, k_b = jax.random.split(key, 3)

    # LinearClassifier(name='resnet50', num_classes=10) -> feat_dim = 2048.
    batch, feat_dim, num_classes = 2, 2048, 10

    features = jax.random.normal(k_x, (batch, feat_dim), jnp.float32)
    weight = jax.random.normal(k_w, (num_classes, feat_dim),
                               jnp.float32) / np.sqrt(feat_dim)
    bias = 0.1 * jax.random.normal(k_b, (num_classes,), jnp.float32)

    # Init-time packing (once), off the per-call path.
    w_packed, b_packed, _, _ = pack_linear_params(weight, bias)

    out = jax.block_until_ready(
        linear_classifier(features, w_packed, b_packed,
                          num_classes=num_classes, feat_dim=feat_dim))
    assert out.shape == (batch, num_classes)

    # Pure-JAX f32 reference; bf16 MXU inputs (f32 accumulation) -> loosened tol.
    ref = features @ weight.T + bias
    np.testing.assert_allclose(np.asarray(out), np.asarray(ref),
                               rtol=2e-2, atol=2e-2)

    print("KERNEL_OK")
</pallas_src>

<mosaic_0001>
module attributes {stable_mosaic.version = 11 : i64} {
  func.func @_linear_kernel(%arg0: i32, %arg1: memref<16x2048xbf16, #tpu.memory_space<vmem>>, %arg2: memref<2048x128xbf16, #tpu.memory_space<vmem>>, %arg3: memref<1x128xf32, #tpu.memory_space<vmem>>, %arg4: memref<16x128xf32, #tpu.memory_space<vmem>>) attributes {dimension_semantics = [#tpu.dimension_semantics<parallel>], iteration_bounds = array<i64: 1>, scalar_prefetch = 0 : i64, scratch_operands = 0 : i64, tpu.core_type = #tpu.core_type<tc>, window_params = [{transform_indices = @transform_0, window_bounds = array<i64: 16, 2048>}, {pipeline_mode = #tpu.pipeline_mode<synchronous>, transform_indices = @transform_1, window_bounds = array<i64: 2048, 128>}, {pipeline_mode = #tpu.pipeline_mode<synchronous>, transform_indices = @transform_2, window_bounds = array<i64: 1, 128>}, {transform_indices = @transform_3, window_bounds = array<i64: 16, 128>}]} {
    %c0 = arith.constant 0 : index
    %c0_0 = arith.constant 0 : index
    %0 = vector.load %arg1[%c0, %c0_0] : memref<16x2048xbf16, #tpu.memory_space<vmem>>, vector<16x2048xbf16>
    %c0_1 = arith.constant 0 : index
    %c0_2 = arith.constant 0 : index
    %1 = vector.load %arg2[%c0_1, %c0_2] : memref<2048x128xbf16, #tpu.memory_space<vmem>>, vector<2048x128xbf16>
    %cst = arith.constant dense<0.000000e+00> : vector<16x128xf32>
    %2 = tpu.matmul %0, %1, %cst {dimension_numbers = #tpu.dot_dimension_numbers<[1], [0], [0], [1], [0, 0, 1, 1], [], []>} : vector<16x2048xbf16>, vector<2048x128xbf16>, vector<16x128xf32> -> vector<16x128xf32>
    %c0_3 = arith.constant 0 : index
    %c0_4 = arith.constant 0 : index
    %3 = vector.load %arg3[%c0_3, %c0_4] : memref<1x128xf32, #tpu.memory_space<vmem>>, vector<1x128xf32>
    %4 = vector.broadcast %3 : vector<1x128xf32> to vector<16x128xf32>
    %5 = arith.addf %2, %4 : vector<16x128xf32>
    %c0_5 = arith.constant 0 : index
    %c0_6 = arith.constant 0 : index
    %6 = vector.load %arg4[%c0_5, %c0_6] : memref<16x128xf32, #tpu.memory_space<vmem>>, vector<16x128xf32>
    tpu.vector_store %arg4[%c0_5, %c0_6], %5 {strides = array<i32>} : memref<16x128xf32, #tpu.memory_space<vmem>>, vector<16x128xf32>,
    return
  }
  func.func @transform_0(%arg0: i32) -> (i32, i32) {
    %c0_i32 = arith.constant 0 : i32
    %c0_i32_0 = arith.constant 0 : i32
    return %arg0, %c0_i32 : i32, i32
  }
  func.func @transform_1(%arg0: i32) -> (i32, i32) {
    %c0_i32 = arith.constant 0 : i32
    %c0_i32_0 = arith.constant 0 : i32
    %c0_i32_1 = arith.constant 0 : i32
    return %c0_i32, %c0_i32_0 : i32, i32
  }
  func.func @transform_2(%arg0: i32) -> (i32, i32) {
    %c0_i32 = arith.constant 0 : i32
    %c0_i32_0 = arith.constant 0 : i32
    %c0_i32_1 = arith.constant 0 : i32
    return %c0_i32, %c0_i32_0 : i32, i32
  }
  func.func @transform_3(%arg0: i32) -> (i32, i32) {
    %c0_i32 = arith.constant 0 : i32
    %c0_i32_0 = arith.constant 0 : i32
    return %arg0, %c0_i32 : i32, i32
  }
}

</mosaic_0001>

<bundles_post_ra>
// kernel: linear_classifier.1
= control target key start
LH: loop header
LB: loop body
LE: loop exit
PB: predicated region body
PF: predicated region fallthrough
CT: control target
= control target key end

     0   :  { %8 = vsyncpa [#allocation3], 0  ;;  %s1967_s12 = smov [#allocation2]   ;;  %s2059_s0 = inlined_call_operand.vmem [shape: bf16[16,2048], index: 0, kind: input, shape index: {}]   ;;  %s2060_s1 = inlined_call_operand.hbm [shape: bf16[2048,128], index: 1, kind: input, shape index: {}]   ;;  %s2061_s2 = inlined_call_operand.vmem [shape: f32[1,128], index: 2, kind: input, shape index: {}]   ;;  %s2062_s3 = inlined_call_operand.vmem [shape: f32[16,128], index: 3, kind: output, shape index: {}]  }
   0x1   :  { %s16_s13 = sshll.u32 %s1967_s12, 4  ;;  %s1943_s16 = scalar_lea.hbm %s2060_s1, 16384  ;;  %s17_s13 = int_to_ptr.vmem [resolvable:$true] %s16_s13 }
   0x2   :  { %p1944_p0 = scmp.ne.s32.totalorder %s2060_s1, %s1943_s16  ;;  %p1947_p1 = scmp.lt.u32.totalorder %s1943_s16, %s2060_s1 }
   0x4   :  { %p1949_p2 = pnand %p1947_p1, %p1944_p0 }
   0x6   :  { %1952 = shalt.err (!%p1949_p2)
}
   0x7   :  { %s1953_s21 = scalar_lea.vmem %s17_s13, 16384  ;;  %p1958_p4 = scmp.lt.s32.totalorder %s17_s13, %s17_s13 }
   0x8   :  { %p1954_p3 = scmp.ne.s32.totalorder %s17_s13, %s1953_s21  ;;  %p1959_p5 = scmp.lt.s32.totalorder %s1953_s21, %s1953_s21 }
   0xa   :  { %p1960_p6 = por %p1959_p5, %p1958_p4 }
   0xc   :  { %p1961_p7 = pnand %p1960_p6, %p1954_p3 }
   0xe   :  { %1964 = shalt.err (!%p1961_p7)
}
   0xf   :  { %s1968_s22 = smov 64   ;;  %s1969_s23 = smov 4  }
  0x10   :  { %22 = dma.hbm_to_vmem [thread:$0]  %s2060_s1, 16384, %s17_s13, [#allocation3], %s1968_s22, %s1968_s22, %s1969_s23  }
  0x11   :  { %1965 = dma.done.wait [#allocation3], 16384  }
  0x12   :  { %1966 = vsyncadd [#allocation3], 4294950912  ;;  %v1815_v0 = vld [vmem:[#allocation2 + $0x40] sm:$0xff]   ;;  %v1819_v4 = vld [vmem:[#allocation2 + $0x48] sm:$0xff]  }
  0x13   :  { %v1816_v1 = vld [vmem:[#allocation2 + $0xc0] sm:$0xff]   ;;  %1636 = vmatprep.subr.bf16.mxu0 %v1815_v0  ;;  %v1820_v5 = vld [vmem:[#allocation2 + $0xc8] sm:$0xff]   ;;  %v1823_v8 = vld [vmem:[#allocation2 + $0x50] sm:$0xff]  }
  0x14   :  { %v1817_v2 = vld [vmem:[#allocation2] sm:$0xff]   ;;  %1658 = vmatprep.subr.bf16.mxu1 %v1816_v1  ;;  %v1821_v6 = vld [vmem:[#allocation2 + $0x8] sm:$0xff]   ;;  %v1824_v9 = vld [vmem:[#allocation2 + $0xd0] sm:$0xff]  }
  0x15   :  { %v1818_v3 = vld [vmem:[#allocation2 + $0x80] sm:$0xff]   ;;  %1637 = vmatpush3.bf16.msra.mxu0 %v1817_v2  ;;  %v1822_v7 = vld [vmem:[#allocation2 + $0x88] sm:$0xff]   ;;  %v1825_v10 = vld [vmem:[#allocation2 + $0x10] sm:$0xff]  }
  0x16   :  { %1659 = vmatpush3.bf16.msra.mxu1 %v1818_v3  ;;  %1638 = vmatprep.subr.bf16.mxu0 %v1819_v4  ;;  %v1826_v11 = vld [vmem:[#allocation2 + $0x90] sm:$0xff]   ;;  %v1827_v12 = vld [vmem:[#allocation2 + $0x58] sm:$0xff]   ;;  %v1831_v16 = vld [vmem:[#allocation2 + $0x60] sm:$0xff]  }
  0x17   :  { %1660 = vmatprep.subr.bf16.mxu1 %v1820_v5  ;;  %v1828_v13 = vld [vmem:[#allocation2 + $0xd8] sm:$0xff]   ;;  %v1832_v17 = vld [vmem:[#allocation2 + $0xe0] sm:$0xff]   ;;  %v1835_v20 = vld [vmem:[#allocation2 + $0x68] sm:$0xff]  }
  0x18   :  { %v1829_v14 = vld [vmem:[#allocation2 + $0x18] sm:$0xff]   ;;  %v1833_v18 = vld [vmem:[#allocation2 + $0x20] sm:$0xff]   ;;  %v1836_v21 = vld [vmem:[#allocation2 + $0xe8] sm:$0xff]  }
  0x19   :  { %1639 = vmatpush3.bf16.msra.mxu0 %v1821_v6  ;;  %v1830_v15 = vld [vmem:[#allocation2 + $0x98] sm:$0xff]   ;;  %v1834_v19 = vld [vmem:[#allocation2 + $0xa0] sm:$0xff]   ;;  %v1837_v22 = vld [vmem:[#allocation2 + $0x28] sm:$0xff]  }
  0x1a   :  { %1661 = vmatpush3.bf16.msra.mxu1 %v1822_v7  ;;  %1640 = vmatprep.subr.bf16.mxu0 %v1823_v8  ;;  %v1838_v23 = vld [vmem:[#allocation2 + $0xa8] sm:$0xff]   ;;  %v1839_v24 = vld [vmem:[#allocation2 + $0x70] sm:$0xff]   ;;  %v1843_v28 = vld [vmem:[#allocation2 + $0x78] sm:$0xff]  }
  0x1b   :  { %1662 = vmatprep.subr.bf16.mxu1 %v1824_v9  ;;  %v1840_v25 = vld [vmem:[#allocation2 + $0xf0] sm:$0xff]   ;;  %v1844_v29 = vld [vmem:[#allocation2 + $0xf8] sm:$0xff]   ;;  %v29_v32 = vld [vmem:[%s2059_s0] sm:$0xff] }
  0x1c   :  { %v1841_v26 = vld [vmem:[#allocation2 + $0x30] sm:$0xff]   ;;  %v1845_v30 = vld [vmem:[#allocation2 + $0x38] sm:$0xff]   ;;  %v37_v33 = vld [vmem:[%s2059_s0 + $0x40] sm:$0xff] }
  0x1d   :  { %1641 = vmatpush3.bf16.msra.mxu0 %v1825_v10  ;;  %v1842_v27 = vld [vmem:[#allocation2 + $0xb0] sm:$0xff]   ;;  %v1846_v31 = vld [vmem:[#allocation2 + $0xb8] sm:$0xff]   ;;  %v30_v34 = vld [vmem:[%s2059_s0 + $0x8] sm:$0xff]  ;;  %v1492_v35 = vcombine.low %v29_v32, %v37_v33  ;;  %v1493_v36 = vcombine.high %v29_v32, %v37_v33 }
  0x1e   :  { %1663 = vmatpush3.bf16.msra.mxu1 %v1826_v11  ;;  %1642 = vmatprep.subr.bf16.mxu0 %v1827_v12  ;;  %v38_v37 = vld [vmem:[%s2059_s0 + $0x48] sm:$0xff]  ;;  %v1847_v40 = vld [vmem:[#allocation2 + $0x140] sm:$0xff]   ;;  %v1855_v48 = vld [vmem:[#allocation2 + $0x150] sm:$0xff]  }
  0x1f   :  { %1664 = vmatprep.subr.bf16.mxu1 %v1828_v13  ;;  %v1494_v38 = vcombine.low %v30_v34, %v38_v37  ;;  %v1495_v39 = vcombine.high %v30_v34, %v38_v37  ;;  %1188 = vmatprep.mubr.bf16.mxu0 %v1493_v36  ;;  %v1848_v41 = vld [vmem:[#allocation2 + $0x1c0] sm:$0xff]   ;;  %v1851_v44 = vld [vmem:[#allocation2 + $0x148] sm:$0xff]   ;;  %v1856_v49 = vld [vmem:[#allocation2 + $0x1d0] sm:$0xff]  }
  0x20   :  { %v1849_v42 = vld [vmem:[#allocation2 + $0x100] sm:$0xff]   ;;  %v1852_v45 = vld [vmem:[#allocation2 + $0x1c8] sm:$0xff]   ;;  %v1857_v50 = vld [vmem:[#allocation2 + $0x110] sm:$0xff]  }
  0x21   :  { %1643 = vmatpush3.bf16.msra.mxu0 %v1829_v14  ;;  %1229 = vmatprep.mubr.bf16.mxu1 %v1495_v39  ;;  %v1850_v43 = vld [vmem:[#allocation2 + $0x180] sm:$0xff]   ;;  %v1853_v46 = vld [vmem:[#allocation2 + $0x108] sm:$0xff]   ;;  %v1858_v51 = vld [vmem:[#allocation2 + $0x190] sm:$0xff]  }
  0x22   :  { %1665 = vmatpush3.bf16.msra.mxu1 %v1830_v15  ;;  %1644 = vmatprep.subr.bf16.mxu0 %v1831_v16  ;;  %v1854_v47 = vld [vmem:[#allocation2 + $0x188] sm:$0xff]   ;;  %v1859_v52 = vld [vmem:[#allocation2 + $0x158] sm:$0xff]   ;;  %v1863_v56 = vld [vmem:[#allocation2 + $0x160] sm:$0xff]  }
  0x23   :  { %1666 = vmatprep.subr.bf16.mxu1 %v1832_v17  ;;  %v1860_v53 = vld [vmem:[#allocation2 + $0x1d8] sm:$0xff]   ;;  %v1864_v57 = vld [vmem:[#allocation2 + $0x1e0] sm:$0xff]   ;;  %v1867_v60 = vld [vmem:[#allocation2 + $0x168] sm:$0xff]  }
  0x24   :  { %v1861_v54 = vld [vmem:[#allocation2 + $0x118] sm:$0xff]   ;;  %v1865_v58 = vld [vmem:[#allocation2 + $0x120] sm:$0xff]   ;;  %v1868_v61 = vld [vmem:[#allocation2 + $0x1e8] sm:$0xff]  }
  0x25   :  { %1645 = vmatpush3.bf16.msra.mxu0 %v1833_v18  ;;  %v1862_v55 = vld [vmem:[#allocation2 + $0x198] sm:$0xff]   ;;  %v1866_v59 = vld [vmem:[#allocation2 + $0x1a0] sm:$0xff]   ;;  %v1869_v62 = vld [vmem:[#allocation2 + $0x128] sm:$0xff]  }
  0x26   :  { %1667 = vmatpush3.bf16.msra.mxu1 %v1834_v19  ;;  %1646 = vmatprep.subr.bf16.mxu0 %v1835_v20  ;;  %v1870_v63 = vld [vmem:[#allocation2 + $0x1a8] sm:$0xff]   ;;  %v1871_v0 = vld [vmem:[#allocation2 + $0x170] sm:$0xff]   ;;  %v1875_v4 = vld [vmem:[#allocation2 + $0x178] sm:$0xff]  }
  0x27   :  { %1668 = vmatprep.subr.bf16.mxu1 %v1836_v21  ;;  %v1872_v1 = vld [vmem:[#allocation2 + $0x1f0] sm:$0xff]   ;;  %v1876_v5 = vld [vmem:[#allocation2 + $0x1f8] sm:$0xff]   ;;  %v1879_v16 = vld [vmem:[#allocation2 + $0x240] sm:$0xff]  }
  0x28   :  { %v1873_v2 = vld [vmem:[#allocation2 + $0x130] sm:$0xff]   ;;  %v1877_v6 = vld [vmem:[#allocation2 + $0x138] sm:$0xff]   ;;  %v1880_v17 = vld [vmem:[#allocation2 + $0x2c0] sm:$0xff]  }
  0x29   :  { %1647 = vmatpush3.bf16.msra.mxu0 %v1837_v22  ;;  %v1874_v3 = vld [vmem:[#allocation2 + $0x1b0] sm:$0xff]   ;;  %v1878_v7 = vld [vmem:[#allocation2 + $0x1b8] sm:$0xff]   ;;  %v1881_v18 = vld [vmem:[#allocation2 + $0x200] sm:$0xff]  }
  0x2a   :  { %1669 = vmatpush3.bf16.msra.mxu1 %v1838_v23  ;;  %1648 = vmatprep.subr.bf16.mxu0 %v1839_v24  ;;  %v31_v8 = vld [vmem:[%s2059_s0 + $0x10] sm:$0xff]  ;;  %v32_v12 = vld [vmem:[%s2059_s0 + $0x18] sm:$0xff]  ;;  %v1882_v19 = vld [vmem:[#allocation2 + $0x280] sm:$0xff]  }
  0x2b   :  { %1670 = vmatprep.subr.bf16.mxu1 %v1840_v25  ;;  %v39_v9 = vld [vmem:[%s2059_s0 + $0x50] sm:$0xff]  ;;  %v40_v13 = vld [vmem:[%s2059_s0 + $0x58] sm:$0xff]  ;;  %v1883_v20 = vld [vmem:[#allocation2 + $0x248] sm:$0xff]  }
  0x2c   :  { %v1496_v10 = vcombine.low %v31_v8, %v39_v9  ;;  %v1497_v11 = vcombine.high %v31_v8, %v39_v9  ;;  %v1498_v14 = vcombine.low %v32_v12, %v40_v13  ;;  %v1499_v15 = vcombine.high %v32_v12, %v40_v13  ;;  %v1884_v21 = vld [vmem:[#allocation2 + $0x2c8] sm:$0xff]   ;;  %v1887_v24 = vld [vmem:[#allocation2 + $0x250] sm:$0xff]   ;;  %v1895_v32 = vld [vmem:[#allocation2 + $0x260] sm:$0xff]  }
  0x2d   :  { %1649 = vmatpush3.bf16.msra.mxu0 %v1841_v26  ;;  %v1885_v22 = vld [vmem:[#allocation2 + $0x208] sm:$0xff]   ;;  %v1888_v25 = vld [vmem:[#allocation2 + $0x2d0] sm:$0xff]   ;;  %v1896_v33 = vld [vmem:[#allocation2 + $0x2e0] sm:$0xff]  }
  0x2e   :  { %1671 = vmatpush3.bf16.msra.mxu1 %v1842_v27  ;;  %1650 = vmatprep.subr.bf16.mxu0 %v1843_v28  ;;  %v1886_v23 = vld [vmem:[#allocation2 + $0x288] sm:$0xff]   ;;  %v1889_v26 = vld [vmem:[#allocation2 + $0x210] sm:$0xff]   ;;  %v1891_v28 = vld [vmem:[#allocation2 + $0x258] sm:$0xff]  }
  0x2f   :  { %1672 = vmatprep.subr.bf16.mxu1 %v1844_v29  ;;  %v1890_v27 = vld [vmem:[#allocation2 + $0x290] sm:$0xff]   ;;  %v1892_v29 = vld [vmem:[#allocation2 + $0x2d8] sm:$0xff]   ;;  %v1897_v34 = vld [vmem:[#allocation2 + $0x220] sm:$0xff]  }
  0x30   :  { %v1899_v36 = vld [vmem:[#allocation2 + $0x268] sm:$0xff]   ;;  %v1927_v8 = vld [vmem:[#allocation2 + $0x360] sm:$0xff]  }
  0x31   :  { %1651 = vmatpush3.bf16.msra.mxu0 %v1845_v30  ;;  %v1893_v30 = vld [vmem:[#allocation2 + $0x218] sm:$0xff]   ;;  %v1900_v37 = vld [vmem:[#allocation2 + $0x2e8] sm:$0xff]   ;;  %v1928_v9 = vld [vmem:[#allocation2 + $0x3e0] sm:$0xff]  }
  0x32   :  { %1673 = vmatpush3.bf16.msra.mxu1 %v1846_v31  ;;  %1680 = vmatprep.subr.bf16.mxu0 %v1847_v40  ;;  %v1894_v31 = vld [vmem:[#allocation2 + $0x298] sm:$0xff]   ;;  %v1902_v39 = vld [vmem:[#allocation2 + $0x2a8] sm:$0xff]   ;;  %v1903_v40 = vld [vmem:[#allocation2 + $0x270] sm:$0xff]  }
  0x33   :  { %1702 = vmatprep.subr.bf16.mxu1 %v1848_v41  ;;  %v1904_v41 = vld [vmem:[#allocation2 + $0x2f0] sm:$0xff]   ;;  %v1931_v12 = vld [vmem:[#allocation2 + $0x368] sm:$0xff]  }
  0x34   :  { %1189 = vmatmul.mubr.bf16.vlgmr.msra.gmra.mrb[0].mxu0 %v1492_v35  ;;  %v1898_v35 = vld [vmem:[#allocation2 + $0x2a0] sm:$0xff]   ;;  %v1932_v13 = vld [vmem:[#allocation2 + $0x3e8] sm:$0xff]  }
  0x35   :  { %1230 = vmatmul.mubr.bf16.vlgmr.msra.gmra.mrb[0].mxu1 %v1494_v38  ;;  %1681 = vmatpush3.bf16.msra.mxu0 %v1849_v42  ;;  %v1901_v38 = vld [vmem:[#allocation2 + $0x228] sm:$0xff]   ;;  %v1905_v42 = vld [vmem:[#allocation2 + $0x230] sm:$0xff]  }
  0x36   :  { %1703 = vmatpush3.bf16.msra.mxu1 %v1850_v43  ;;  %1682 = vmatprep.subr.bf16.mxu0 %v1851_v44  ;;  %v1906_v43 = vld [vmem:[#allocation2 + $0x2b0] sm:$0xff]   ;;  %v1907_v44 = vld [vmem:[#allocation2 + $0x278] sm:$0xff]  }
  0x37   :  { %1704 = vmatprep.subr.bf16.mxu1 %v1852_v45  ;;  %1270 = vmatprep.mubr.bf16.mxu0 %v1497_v11  ;;  %v1908_v45 = vld [vmem:[#allocation2 + $0x2f8] sm:$0xff]   ;;  %v1930_v11 = vld [vmem:[#allocation2 + $0x3a0] sm:$0xff]  }
  0x38   :  { %1311 = vmatprep.mubr.bf16.mxu1 %v1499_v15  ;;  %v1934_v15 = vld [vmem:[#allocation2 + $0x3a8] sm:$0xff]  }
  0x39   :  { %1683 = vmatpush3.bf16.msra.mxu0 %v1853_v46  ;;  %v1909_v46 = vld [vmem:[#allocation2 + $0x238] sm:$0xff]  }
  0x3a   :  { %1705 = vmatpush3.bf16.msra.mxu1 %v1854_v47  ;;  %1684 = vmatprep.subr.bf16.mxu0 %v1855_v48  ;;  %v1910_v47 = vld [vmem:[#allocation2 + $0x2b8] sm:$0xff]   ;;  %v33_v48 = vld [vmem:[%s2059_s0 + $0x20] sm:$0xff] }
  0x3b   :  { %1706 = vmatprep.subr.bf16.mxu1 %v1856_v49  ;;  %v41_v49 = vld [vmem:[%s2059_s0 + $0x60] sm:$0xff] }
  0x3d   :  { %1685 = vmatpush3.bf16.msra.mxu0 %v1857_v50  ;;  %v34_v50 = vld [vmem:[%s2059_s0 + $0x28] sm:$0xff] }
  0x3e   :  { %1707 = vmatpush3.bf16.msra.mxu1 %v1858_v51  ;;  %1686 = vmatprep.subr.bf16.mxu0 %v1859_v52  ;;  %v42_v51 = vld [vmem:[%s2059_s0 + $0x68] sm:$0xff]  ;;  %v1500_v52 = vcombine.low %v33_v48, %v41_v49 }
  0x3f   :  { %1708 = vmatprep.subr.bf16.mxu1 %v1860_v53  ;;  %v1501_v53 = vcombine.high %v33_v48, %v41_v49 }
  0x41   :  { %1687 = vmatpush3.bf16.msra.mxu0 %v1861_v54  ;;  %v1502_v54 = vcombine.low %v34_v50, %v42_v51 }
  0x42   :  { %1709 = vmatpush3.bf16.msra.mxu1 %v1862_v55  ;;  %1688 = vmatprep.subr.bf16.mxu0 %v1863_v56  ;;  %v1503_v55 = vcombine.high %v34_v50, %v42_v51  ;;  %v1911_v56 = vld [vmem:[#allocation2 + $0x340] sm:$0xff]  }
  0x43   :  { %1710 = vmatprep.subr.bf16.mxu1 %v1864_v57  ;;  %v1912_v57 = vld [vmem:[#allocation2 + $0x3c0] sm:$0xff]  }
  0x45   :  { %1689 = vmatpush3.bf16.msra.mxu0 %v1865_v58  ;;  %v1913_v58 = vld [vmem:[#allocation2 + $0x300] sm:$0xff]  }
  0x46   :  { %1711 = vmatpush3.bf16.msra.mxu1 %v1866_v59  ;;  %1690 = vmatprep.subr.bf16.mxu0 %v1867_v60  ;;  %v1914_v59 = vld [vmem:[#allocation2 + $0x380] sm:$0xff]   ;;  %v1915_v60 = vld [vmem:[#allocation2 + $0x348] sm:$0xff]  }
  0x47   :  { %1712 = vmatprep.subr.bf16.mxu1 %v1868_v61  ;;  %v1916_v61 = vld [vmem:[#allocation2 + $0x3c8] sm:$0xff]  }
  0x49   :  { %1691 = vmatpush3.bf16.msra.mxu0 %v1869_v62  ;;  %v1917_v62 = vld [vmem:[#allocation2 + $0x308] sm:$0xff]  }
  0x4a   :  { %1713 = vmatpush3.bf16.msra.mxu1 %v1870_v63  ;;  %1692 = vmatprep.subr.bf16.mxu0 %v1871_v0  ;;  %v1918_v63 = vld [vmem:[#allocation2 + $0x388] sm:$0xff]   ;;  %v1919_v0 = vld [vmem:[#allocation2 + $0x350] sm:$0xff]  }
  0x4b   :  { %1714 = vmatprep.subr.bf16.mxu1 %v1872_v1  ;;  %v1920_v1 = vld [vmem:[#allocation2 + $0x3d0] sm:$0xff]  }
  0x4d   :  { %1693 = vmatpush3.bf16.msra.mxu0 %v1873_v2  ;;  %v1921_v2 = vld [vmem:[#allocation2 + $0x310] sm:$0xff]  }
  0x4e   :  { %1715 = vmatpush3.bf16.msra.mxu1 %v1874_v3  ;;  %1694 = vmatprep.subr.bf16.mxu0 %v1875_v4  ;;  %v1922_v3 = vld [vmem:[#allocation2 + $0x390] sm:$0xff]   ;;  %v1923_v4 = vld [vmem:[#allocation2 + $0x358] sm:$0xff]  }
  0x4f   :  { %1716 = vmatprep.subr.bf16.mxu1 %v1876_v5  ;;  %v1924_v5 = vld [vmem:[#allocation2 + $0x3d8] sm:$0xff]  }
  0x51   :  { %1695 = vmatpush3.bf16.msra.mxu0 %v1877_v6  ;;  %v1925_v6 = vld [vmem:[#allocation2 + $0x318] sm:$0xff]  }
  0x52   :  { %1717 = vmatpush3.bf16.msra.mxu1 %v1878_v7  ;;  %1724 = vmatprep.subr.bf16.mxu0 %v1879_v16  ;;  %v1926_v7 = vld [vmem:[#allocation2 + $0x398] sm:$0xff]   ;;  %v1935_v16 = vld [vmem:[#allocation2 + $0x370] sm:$0xff]  }
  0x53   :  { %1746 = vmatprep.subr.bf16.mxu1 %v1880_v17  ;;  %v1936_v17 = vld [vmem:[#allocation2 + $0x3f0] sm:$0xff]  }
  0x54   :  { %1271 = vmatmul.mubr.bf16.vlgmr.msra.gmra.mrb[4].mxu0 %v1496_v10  ;;  %v1929_v10 = vld [vmem:[#allocation2 + $0x320] sm:$0xff]  }
  0x55   :  { %1312 = vmatmul.mubr.bf16.vlgmr.msra.gmra.mrb[4].mxu1 %v1498_v14  ;;  %1725 = vmatpush3.bf16.msra.mxu0 %v1881_v18  ;;  %v1933_v14 = vld [vmem:[#allocation2 + $0x328] sm:$0xff]   ;;  %v1937_v18 = vld [vmem:[#allocation2 + $0x330] sm:$0xff]  }
  0x56   :  { %1747 = vmatpush3.bf16.msra.mxu1 %v1882_v19  ;;  %1726 = vmatprep.subr.bf16.mxu0 %v1883_v20  ;;  %v1938_v19 = vld [vmem:[#allocation2 + $0x3b0] sm:$0xff]   ;;  %v1939_v20 = vld [vmem:[#allocation2 + $0x378] sm:$0xff]  }
  0x57   :  { %1748 = vmatprep.subr.bf16.mxu1 %v1884_v21  ;;  %1352 = vmatprep.mubr.bf16.mxu0 %v1501_v53  ;;  %v1940_v21 = vld [vmem:[#allocation2 + $0x3f8] sm:$0xff]  }
  0x58   :  { %1393 = vmatprep.mubr.bf16.mxu1 %v1503_v55 }
  0x59   :  { %1727 = vmatpush3.bf16.msra.mxu0 %v1885_v22  ;;  %v1941_v22 = vld [vmem:[#allocation2 + $0x338] sm:$0xff]  }
  0x5a   :  { %1749 = vmatpush3.bf16.msra.mxu1 %v1886_v23  ;;  %1728 = vmatprep.subr.bf16.mxu0 %v1887_v24  ;;  %v1942_v23 = vld [vmem:[#allocation2 + $0x3b8] sm:$0xff]   ;;  %v35_v24 = vld [vmem:[%s2059_s0 + $0x30] sm:$0xff] }
  0x5b   :  { %1750 = vmatprep.subr.bf16.mxu1 %v1888_v25  ;;  %v43_v25 = vld [vmem:[%s2059_s0 + $0x70] sm:$0xff] }
  0x5d   :  { %1729 = vmatpush3.bf16.msra.mxu0 %v1889_v26  ;;  %v36_v26 = vld [vmem:[%s2059_s0 + $0x38] sm:$0xff] }
  0x5e   :  { %1751 = vmatpush3.bf16.msra.mxu1 %v1890_v27  ;;  %1730 = vmatprep.subr.bf16.mxu0 %v1891_v28  ;;  %v1504_v27 = vcombine.low %v35_v24, %v43_v25  ;;  %v1505_v28 = vcombine.high %v35_v24, %v43_v25 }
  0x5f   :  { %1752 = vmatprep.subr.bf16.mxu1 %v1892_v29  ;;  %v44_v29 = vld [vmem:[%s2059_s0 + $0x78] sm:$0xff] }
  0x61   :  { %1731 = vmatpush3.bf16.msra.mxu0 %v1893_v30  ;;  %v1506_v30 = vcombine.low %v36_v26, %v44_v29 }
  0x62   :  { %1753 = vmatpush3.bf16.msra.mxu1 %v1894_v31  ;;  %1732 = vmatprep.subr.bf16.mxu0 %v1895_v32  ;;  %v1507_v31 = vcombine.high %v36_v26, %v44_v29 }
  0x63   :  { %1754 = vmatprep.subr.bf16.mxu1 %v1896_v33 }
  0x65   :  { %1733 = vmatpush3.bf16.msra.mxu0 %v1897_v34  ;;  %v1491_v34 = vld [vmem:[%s2061_s2] ss:$0 sm:$0xff] }
  0x66   :  { %1755 = vmatpush3.bf16.msra.mxu1 %v1898_v35  ;;  %1734 = vmatprep.subr.bf16.mxu0 %v1899_v36 }
  0x67   :  { %1756 = vmatprep.subr.bf16.mxu1 %v1900_v37 }
  0x69   :  { %1735 = vmatpush3.bf16.msra.mxu0 %v1901_v38 }
  0x6a   :  { %1757 = vmatpush3.bf16.msra.mxu1 %v1902_v39  ;;  %1736 = vmatprep.subr.bf16.mxu0 %v1903_v40 }
  0x6b   :  { %1758 = vmatprep.subr.bf16.mxu1 %v1904_v41 }
  0x6d   :  { %1737 = vmatpush3.bf16.msra.mxu0 %v1905_v42 }
  0x6e   :  { %1759 = vmatpush3.bf16.msra.mxu1 %v1906_v43  ;;  %1738 = vmatprep.subr.bf16.mxu0 %v1907_v44 }
  0x6f   :  { %1760 = vmatprep.subr.bf16.mxu1 %v1908_v45 }
  0x71   :  { %1739 = vmatpush3.bf16.msra.mxu0 %v1909_v46 }
  0x72   :  { %1761 = vmatpush3.bf16.msra.mxu1 %v1910_v47  ;;  %1768 = vmatprep.subr.bf16.mxu0 %v1911_v56 }
  0x73   :  { %1790 = vmatprep.subr.bf16.mxu1 %v1912_v57 }
  0x74   :  { %1353 = vmatmul.mubr.bf16.vlgmr.msra.gmra.mrb[8].mxu0 %v1500_v52 }
  0x75   :  { %1394 = vmatmul.mubr.bf16.vlgmr.msra.gmra.mrb[8].mxu1 %v1502_v54  ;;  %1769 = vmatpush3.bf16.msra.mxu0 %v1913_v58 }
  0x76   :  { %1791 = vmatpush3.bf16.msra.mxu1 %v1914_v59  ;;  %1770 = vmatprep.subr.bf16.mxu0 %v1915_v60 }
  0x77   :  { %1792 = vmatprep.subr.bf16.mxu1 %v1916_v61  ;;  %1434 = vmatprep.mubr.bf16.mxu0 %v1505_v28 }
  0x78   :  { %1475 = vmatprep.mubr.bf16.mxu1 %v1507_v31 }
  0x79   :  { %1771 = vmatpush3.bf16.msra.mxu0 %v1917_v62 }
  0x7a   :  { %1793 = vmatpush3.bf16.msra.mxu1 %v1918_v63  ;;  %1772 = vmatprep.subr.bf16.mxu0 %v1919_v0 }
  0x7b   :  { %1794 = vmatprep.subr.bf16.mxu1 %v1920_v1 }
  0x7d   :  { %1773 = vmatpush3.bf16.msra.mxu0 %v1921_v2 }
  0x7e   :  { %1795 = vmatpush3.bf16.msra.mxu1 %v1922_v3  ;;  %1774 = vmatprep.subr.bf16.mxu0 %v1923_v4 }
  0x7f   :  { %1796 = vmatprep.subr.bf16.mxu1 %v1924_v5 }
  0x81   :  { %1775 = vmatpush3.bf16.msra.mxu0 %v1925_v6 }
  0x82   :  { %1797 = vmatpush3.bf16.msra.mxu1 %v1926_v7  ;;  %1776 = vmatprep.subr.bf16.mxu0 %v1927_v8 }
  0x83   :  { %1798 = vmatprep.subr.bf16.mxu1 %v1928_v9 }
  0x85   :  { %1777 = vmatpush3.bf16.msra.mxu0 %v1929_v10 }
  0x86   :  { %1799 = vmatpush3.bf16.msra.mxu1 %v1930_v11  ;;  %1778 = vmatprep.subr.bf16.mxu0 %v1931_v12 }
  0x87   :  { %1800 = vmatprep.subr.bf16.mxu1 %v1932_v13 }
  0x89   :  { %1779 = vmatpush3.bf16.msra.mxu0 %v1933_v14 }
  0x8a   :  { %1801 = vmatpush3.bf16.msra.mxu1 %v1934_v15  ;;  %1780 = vmatprep.subr.bf16.mxu0 %v1935_v16 }
  0x8b   :  { %1802 = vmatprep.subr.bf16.mxu1 %v1936_v17 }
  0x8d   :  { %1781 = vmatpush3.bf16.msra.mxu0 %v1937_v18 }
  0x8e   :  { %1803 = vmatpush3.bf16.msra.mxu1 %v1938_v19  ;;  %1782 = vmatprep.subr.bf16.mxu0 %v1939_v20 }
  0x8f   :  { %1804 = vmatprep.subr.bf16.mxu1 %v1940_v21 }
  0x91   :  { %1783 = vmatpush3.bf16.msra.mxu0 %v1941_v22 }
  0x92   :  { %1805 = vmatpush3.bf16.msra.mxu1 %v1942_v23 }
  0x94   :  { %1435 = vmatmul.mubr.bf16.vlgmr.msra.gmra.mrb[12].mxu0 %v1504_v27 }
  0x95   :  { %1476 = vmatmul.mubr.bf16.vlgmr.msra.gmra.mrb[12].mxu1 %v1506_v30 }
 0x107   :  { %v1652_v32 = vpop.f32.mrb[0].mxu0 }
 0x108   :  { %v1674_v33 = vpop.f32.mrb[0].mxu1  ;;  %v1653_v35 = vpop.f32.mrb[1].mxu0 }
 0x109   :  { %v1654_v36 = vadd.f32 %v1653_v35, %v1652_v32  ;;  %v1675_v37 = vpop.f32.mrb[1].mxu1  ;;  %v1655_v38 = vpop.f32.mrb[2].mxu0 }
 0x10a   :  { %v1676_v39 = vadd.f32 %v1675_v37, %v1674_v33  ;;  %v1677_v40 = vpop.f32.mrb[2].mxu1  ;;  %v1656_v41 = vpop.f32.mrb[3].mxu0 }
 0x10b   :  { %v1191_v42 = vadd.f32 %v1654_v36, %v1491_v34  ;;  %v1657_v43 = vadd.f32 %v1656_v41, %v1655_v38  ;;  %v1678_v44 = vpop.f32.mrb[3].mxu1 }
 0x10c   :  { %v1679_v45 = vadd.f32 %v1678_v44, %v1677_v40 }
 0x10d   :  { %v1232_v46 = vadd.f32 %v1676_v39, %v1191_v42  ;;  %v1194_v47 = vadd.f32 %v1657_v43, %v1491_v34 }
 0x10f   :  { %v1235_v48 = vadd.f32 %v1679_v45, %v1194_v47 }
 0x127   :  { %v1696_v49 = vpop.f32.mrb[4].mxu0 }
 0x128   :  { %v1718_v50 = vpop.f32.mrb[4].mxu1  ;;  %v1697_v51 = vpop.f32.mrb[5].mxu0 }
 0x129   :  { %v1698_v52 = vadd.f32 %v1697_v51, %v1696_v49  ;;  %v1719_v53 = vpop.f32.mrb[5].mxu1  ;;  %v1699_v54 = vpop.f32.mrb[6].mxu0 }
 0x12a   :  { %v1720_v55 = vadd.f32 %v1719_v53, %v1718_v50  ;;  %v1721_v56 = vpop.f32.mrb[6].mxu1  ;;  %v1700_v57 = vpop.f32.mrb[7].mxu0 }
 0x12b   :  { %v1273_v58 = vadd.f32 %v1698_v52, %v1232_v46  ;;  %v1701_v59 = vadd.f32 %v1700_v57, %v1699_v54  ;;  %v1722_v60 = vpop.f32.mrb[7].mxu1 }
 0x12c   :  { %v1723_v61 = vadd.f32 %v1722_v60, %v1721_v56 }
 0x12d   :  { %v1314_v62 = vadd.f32 %v1720_v55, %v1273_v58  ;;  %v1276_v63 = vadd.f32 %v1701_v59, %v1235_v48 }
 0x12f   :  { %v1317_v0 = vadd.f32 %v1723_v61, %v1276_v63 }
 0x147   :  { %v1740_v1 = vpop.f32.mrb[8].mxu0 }
 0x148   :  { %v1762_v2 = vpop.f32.mrb[8].mxu1  ;;  %v1741_v3 = vpop.f32.mrb[9].mxu0 }
 0x149   :  { %v1763_v4 = vpop.f32.mrb[9].mxu1  ;;  %v1742_v5 = vadd.f32 %v1741_v3, %v1740_v1  ;;  %v1743_v7 = vpop.f32.mrb[10].mxu0 }
 0x14a   :  { %v1764_v6 = vadd.f32 %v1763_v4, %v1762_v2  ;;  %v1765_v8 = vpop.f32.mrb[10].mxu1  ;;  %v1744_v9 = vpop.f32.mrb[11].mxu0 }
 0x14b   :  { %v1766_v10 = vpop.f32.mrb[11].mxu1  ;;  %v1355_v11 = vadd.f32 %v1742_v5, %v1314_v62  ;;  %v1745_v12 = vadd.f32 %v1744_v9, %v1743_v7 }
 0x14c   :  { %v1767_v13 = vadd.f32 %v1766_v10, %v1765_v8 }
 0x14d   :  { %v1396_v14 = vadd.f32 %v1764_v6, %v1355_v11  ;;  %v1358_v15 = vadd.f32 %v1745_v12, %v1317_v0 }
 0x14f   :  { %v1399_v16 = vadd.f32 %v1767_v13, %v1358_v15 }
 0x167   :  { %v1784_v17 = vpop.f32.mrb[12].mxu0 }
 0x168   :  { %v1806_v18 = vpop.f32.mrb[12].mxu1  ;;  %v1785_v19 = vpop.f32.mrb[13].mxu0 }
 0x169   :  { %v1786_v20 = vadd.f32 %v1785_v19, %v1784_v17  ;;  %v1807_v21 = vpop.f32.mrb[13].mxu1  ;;  %v1787_v22 = vpop.f32.mrb[14].mxu0 }
 0x16a   :  { %v1808_v23 = vadd.f32 %v1807_v21, %v1806_v18  ;;  %v1809_v24 = vpop.f32.mrb[14].mxu1  ;;  %v1788_v25 = vpop.f32.mrb[15].mxu0 }
 0x16b   :  { %v1437_v26 = vadd.f32 %v1786_v20, %v1396_v14  ;;  %v1789_v27 = vadd.f32 %v1788_v25, %v1787_v22  ;;  %v1810_v28 = vpop.f32.mrb[15].mxu1 }
 0x16c   :  { %v1811_v29 = vadd.f32 %v1810_v28, %v1809_v24 }
 0x16d   :  { %v1478_v30 = vadd.f32 %v1808_v23, %v1437_v26  ;;  %v1440_v31 = vadd.f32 %v1789_v27, %v1399_v16 }
 0x16f   :  { %1484 = vst [vmem:[%s2062_s3] sm:$0xff] %v1478_v30  ;;  %v1481_v32 = vadd.f32 %v1811_v29, %v1440_v31 }
 0x171   :  { %1485 = vst [vmem:[%s2062_s3 + $0x8] sm:$0xff] %v1481_v32 }
 0x172   :  { %1490 = vsyncpa [#allocation3], 1 }

</bundles_post_ra>
